<compile_context>
chip_gen: v7x
topology: tpu7x:2x2x1
jax: 0.10.0
libtpu: 0.0.40
codegen_flags: <defaults>
</compile_context>

<pallas_src>
import jax
import jax.numpy as jnp
from jax.experimental import pallas as pl
from jax.experimental.pallas import tpu as pltpu

INPUT_SIZE = 1
STATE_SIZE = 2
OUTPUT_SIZE = 1
STATE_HIDDEN = (32, 32)   # state_neuron_non (2 nonlinear layers)
OUTPUT_HIDDEN = (32,)     # output_neuron_non (1 nonlinear layer)

FEAT_IN = INPUT_SIZE + STATE_SIZE          # 3
FEAT_OUT = OUTPUT_SIZE + STATE_SIZE        # 3  (concat(output, state_d))

HS = STATE_HIDDEN[0]                       # 32
HO = OUTPUT_HIDDEN[0]                      # 32


def _round_up(x, m):
    return ((x + m - 1) // m) * m


def csnn_kernel(x_ref, wa_ref, wb_ref, wch_ref, wcg_ref, out_ref):
    cdt = x_ref.dtype
    x = x_ref[...]                                                    # (3, TN)

    # Fused first layer: all four consumers of x in one MXU pass.
    #   rows 0:HS        -> StateNet_non layer-1 pre-activation
    #   rows HS:HS+HO    -> OutputNet_non layer-1 pre-activation
    #   rows HS+HO:+3    -> [output_lin ; state_d_lin]  (already in output order)
    z = jnp.dot(wa_ref[...], x, preferred_element_type=jnp.float32)  # (67, TN) f32

    # Cast BEFORE tanh: transcendentals run at bf16 rate on v6e/v7x when cdt==bf16.
    h1 = jnp.tanh(z[0:HS, :].astype(cdt))                            # (32, TN)
    g = jnp.tanh(z[HS:HS + HO, :].astype(cdt))                       # (32, TN)
    lin = z[HS + HO:, :]                                             # (3, TN) f32

    # StateNet_non layer 2 (f32 accumulate, cdt activation).
    h2 = jnp.tanh(
        jnp.dot(wb_ref[...], h1, preferred_element_type=jnp.float32).astype(cdt)
    )                                                                # (32, TN)

    # Final projections: two tiny MXU dots, no (64, TN) concat buffer.
    #   wc_h row 0 = 0,     rows 1:3 = StateNet_non out
    #   wc_g row 0 = OutputNet_non out, rows 1:3 = 0
    nonlin = jnp.dot(wch_ref[...], h2, preferred_element_type=jnp.float32)
    nonlin = nonlin + jnp.dot(wcg_ref[...], g, preferred_element_type=jnp.float32)

    out_ref[...] = (nonlin + lin).astype(out_ref.dtype)


def pack_params(params, dtype=jnp.float32):
    """Fuse the 7 (in, out) weight matrices into 4 lane-dense kernel operands."""
    w1s, w2s, w3s, wls, w1o, w2o, wlo = params
    # W_A: (67, 3) = [w1s.T ; w1o.T ; wlo.T ; wls.T]
    wa = jnp.concatenate([w1s.T, w1o.T, wlo.T, wls.T], axis=0)
    # W_B: (32, 32) second StateNet_non layer.
    wb = w2s.T
    # W_Ch: (3, 32) acting on h2 — row 0 (output) is zero, rows 1:3 = StateNet_non out.
    wch = jnp.concatenate(
        [jnp.zeros((OUTPUT_SIZE, STATE_HIDDEN[1]), jnp.float32), w3s.T], axis=0)
    # W_Cg: (3, 32) acting on g — row 0 = OutputNet_non out, rows 1:3 zero.
    wcg = jnp.concatenate(
        [w2o.T, jnp.zeros((STATE_SIZE, OUTPUT_HIDDEN[0]), jnp.float32)], axis=0)
    return (wa.astype(dtype), wb.astype(dtype), wch.astype(dtype), wcg.astype(dtype))


def _tile_for(n, tn, compute_dtype):
    """Lane-dense batch tile: large (amortize ~0.35 us/step), VMEM-safe, grid>=2 when possible."""
    cbytes = jnp.dtype(compute_dtype).itemsize
    tile_cap = 16384 if cbytes == 2 else 8192      # keeps intermediates well under scoped VMEM
    tile = max(128, min(_round_up(max(tn, 128), 128), tile_cap))
    n128 = _round_up(n, 128)
    tile = min(tile, n128)
    if n128 >= 256:
        # grid >= 2 so the 'parallel' batch axis can shard across v7x's two TensorCores.
        tile = min(tile, _round_up(pl.cdiv(n128, 2), 128))
    return tile


def _vmem_limit_bytes(tile, compute_dtype):
    cbytes = jnp.dtype(compute_dtype).itemsize
    per_col = (2 * FEAT_IN * cbytes          # x tile, double-buffered
               + 2 * FEAT_OUT * 4            # out tile (f32), double-buffered
               + (HS + HO + FEAT_OUT) * 4    # z (f32)
               + 3 * HS * cbytes             # h1, g, h2
               + 3 * FEAT_OUT * 4)           # nonlin / lin / sum temps
    est = (per_col * tile * 3) // 2 + (4 << 20)
    return int(min(max(est, 16 << 20), 64 << 20))


def _csnn_pallas(x_t, wa, wb, wch, wcg, tile, vmem_limit):
    n_pad = x_t.shape[1]
    grid = (n_pad // tile,)
    return pl.pallas_call(
        csnn_kernel,
        out_shape=jax.ShapeDtypeStruct((FEAT_OUT, n_pad), jnp.float32),
        grid_spec=pltpu.PrefetchScalarGridSpec(
            num_scalar_prefetch=0,
            grid=grid,
            in_specs=[
                pl.BlockSpec((FEAT_IN, tile), lambda i: (0, i)),   # x tile (lane-dense)
                pl.BlockSpec(wa.shape, lambda i: (0, 0)),          # fused first-layer weight
                pl.BlockSpec(wb.shape, lambda i: (0, 0)),          # StateNet_non layer 2
                pl.BlockSpec(wch.shape, lambda i: (0, 0)),         # final proj (h2 branch)
                pl.BlockSpec(wcg.shape, lambda i: (0, 0)),         # final proj (g branch)
            ],
            out_specs=pl.BlockSpec((FEAT_OUT, tile), lambda i: (0, i)),
        ),
        compiler_params=pltpu.CompilerParams(
            dimension_semantics=("parallel",),
            vmem_limit_bytes=vmem_limit),
    )(x_t, wa, wb, wch, wcg)


def make_csnn_forward(params, *, tn=8192, compute_dtype=jnp.float32):
    """Pack weights once; return a jitted (N, in+state) -> (N, out+state) forward.

    tn: requested batch columns per grid step (rounded to 128, VMEM-capped).
    compute_dtype: jnp.bfloat16 recommended on v6e/v7x (~2x EUP/VPU, half the
                   x-tile HBM traffic); keep float32 on v5e.  Accumulation is f32.
    """
    wa, wb, wch, wcg = pack_params(params, compute_dtype)

    @jax.jit
    def forward(input_state):
        n, feat = input_state.shape
        assert feat == FEAT_IN
        tile = _tile_for(n, tn, compute_dtype)
        n_pad = _round_up(n, tile)
        x_t = input_state.T.astype(compute_dtype)
        if n_pad != n:
            x_t = jnp.pad(x_t, ((0, 0), (0, n_pad - n)))
        out_t = _csnn_pallas(x_t, wa, wb, wch, wcg, tile,
                             _vmem_limit_bytes(tile, compute_dtype))
        # TODO(synk): callers that can consume (feat, N) layout should take out_t
        #             directly and skip this transpose (saves one HBM round trip).
        return out_t[:, :n].T

    return forward


def init_params(key):
    """Deterministic init; weights stored (in_features, out_features), no biases
    (matches nn.Linear(..., bias=False) in the original module)."""
    def lin(k, fan_in, fan_out):
        bound = 1.0 / jnp.sqrt(fan_in)
        return jax.random.uniform(k, (fan_in, fan_out), jnp.float32,
                                  minval=-bound, maxval=bound)

    ks = jax.random.split(key, 7)
    w1s = lin(ks[0], FEAT_IN, STATE_HIDDEN[0])          # StateNet_non layer 1
    w2s = lin(ks[1], STATE_HIDDEN[0], STATE_HIDDEN[1])  # StateNet_non layer 2
    w3s = lin(ks[2], STATE_HIDDEN[1], STATE_SIZE)       # StateNet_non out
    wls = lin(ks[3], FEAT_IN, STATE_SIZE)               # StateNet_lin
    w1o = lin(ks[4], FEAT_IN, OUTPUT_HIDDEN[0])         # OutputNet_non layer 1
    w2o = lin(ks[5], OUTPUT_HIDDEN[0], OUTPUT_SIZE)     # OutputNet_non out
    wlo = lin(ks[6], FEAT_IN, OUTPUT_SIZE)              # OutputNet_lin
    return (w1s, w2s, w3s, wls, w1o, w2o, wlo)


def csnn_reference(x, params):
    w1s, w2s, w3s, wls, w1o, w2o, wlo = params
    h = jnp.tanh(x @ w1s)
    h = jnp.tanh(h @ w2s)
    state_d = h @ w3s + x @ wls
    g = jnp.tanh(x @ w1o)
    output = g @ w2o + x @ wlo
    return jnp.concatenate([output, state_d], axis=1)


if __name__ == "__main__":
    key = jax.random.PRNGKey(0)
    k_params, k_x, k_x2 = jax.random.split(key, 3)

    params = init_params(k_params)
    fwd = make_csnn_forward(params)                     # f32 compute path

    # Small example batch of (input, state) rows.
    N = 64
    input_state = jax.random.normal(k_x, (N, FEAT_IN), jnp.float32)
    out = jax.block_until_ready(fwd(input_state))
    ref = csnn_reference(input_state, params)
    assert out.shape == (N, FEAT_OUT)
    assert jnp.allclose(out, ref, atol=1e-5, rtol=1e-5)

    # Non-multiple batch size: exercises internal padding and grid == 2
    # (the 'parallel' batch axis can shard across two TensorCores on v7x).
    N2 = 1000
    x2 = jax.random.normal(k_x2, (N2, FEAT_IN), jnp.float32)
    out2 = jax.block_until_ready(fwd(x2))
    ref2 = csnn_reference(x2, params)
    assert out2.shape == (N2, FEAT_OUT)
    assert jnp.allclose(out2, ref2, atol=1e-5, rtol=1e-5)

    # bf16 compute path (recommended on v6e/v7x) validated with looser tolerance.
    fwd_bf16 = make_csnn_forward(params, compute_dtype=jnp.bfloat16)
    out3 = jax.block_until_ready(fwd_bf16(x2))
    assert out3.shape == (N2, FEAT_OUT)
    assert jnp.allclose(out3, ref2, atol=5e-2, rtol=5e-2)

    print("KERNEL_OK")
</pallas_src>

<mosaic_0001>
module attributes {stable_mosaic.version = 11 : i64} {
  func.func @csnn_kernel(%arg0: i32, %arg1: memref<3x128xf32, #tpu.memory_space<vmem>>, %arg2: memref<67x3xf32, #tpu.memory_space<vmem>>, %arg3: memref<32x32xf32, #tpu.memory_space<vmem>>, %arg4: memref<3x32xf32, #tpu.memory_space<vmem>>, %arg5: memref<3x32xf32, #tpu.memory_space<vmem>>, %arg6: memref<3x128xf32, #tpu.memory_space<vmem>>) attributes {dimension_semantics = [#tpu.dimension_semantics<parallel>], iteration_bounds = array<i64: 1>, scalar_prefetch = 0 : i64, scratch_operands = 0 : i64, tpu.core_type = #tpu.core_type<tc>, window_params = [{transform_indices = @transform_0, window_bounds = array<i64: 3, 128>}, {pipeline_mode = #tpu.pipeline_mode<synchronous>, transform_indices = @transform_1, window_bounds = array<i64: 67, 3>}, {pipeline_mode = #tpu.pipeline_mode<synchronous>, transform_indices = @transform_2, window_bounds = array<i64: 32, 32>}, {pipeline_mode = #tpu.pipeline_mode<synchronous>, transform_indices = @transform_3, window_bounds = array<i64: 3, 32>}, {pipeline_mode = #tpu.pipeline_mode<synchronous>, transform_indices = @transform_4, window_bounds = array<i64: 3, 32>}, {transform_indices = @transform_5, window_bounds = array<i64: 3, 128>}]} {
    %c0 = arith.constant 0 : index
    %c0_0 = arith.constant 0 : index
    %0 = vector.load %arg1[%c0, %c0_0] : memref<3x128xf32, #tpu.memory_space<vmem>>, vector<3x128xf32>
    %c0_1 = arith.constant 0 : index
    %c0_2 = arith.constant 0 : index
    %1 = vector.load %arg2[%c0_1, %c0_2] : memref<67x3xf32, #tpu.memory_space<vmem>>, vector<67x3xf32>
    %cst = arith.constant dense<0.000000e+00> : vector<67x128xf32>
    %2 = tpu.matmul %1, %0, %cst {dimension_numbers = #tpu.dot_dimension_numbers<[1], [0], [0], [1], [0, 0, 1, 1], [], []>} : vector<67x3xf32>, vector<3x128xf32>, vector<67x128xf32> -> vector<67x128xf32>
    %3 = vector.extract_strided_slice %2 {offsets = [0, 0], sizes = [32, 128], strides = [1, 1]} : vector<67x128xf32> to vector<32x128xf32>
    %4 = math.tanh %3 : vector<32x128xf32>
    %5 = vector.extract_strided_slice %2 {offsets = [32, 0], sizes = [32, 128], strides = [1, 1]} : vector<67x128xf32> to vector<32x128xf32>
    %6 = math.tanh %5 : vector<32x128xf32>
    %7 = vector.extract_strided_slice %2 {offsets = [64, 0], sizes = [3, 128], strides = [1, 1]} : vector<67x128xf32> to vector<3x128xf32>
    %c0_3 = arith.constant 0 : index
    %c0_4 = arith.constant 0 : index
    %8 = vector.load %arg3[%c0_3, %c0_4] : memref<32x32xf32, #tpu.memory_space<vmem>>, vector<32x32xf32>
    %cst_5 = arith.constant dense<0.000000e+00> : vector<32x128xf32>
    %9 = tpu.matmul %8, %4, %cst_5 {dimension_numbers = #tpu.dot_dimension_numbers<[1], [0], [0], [1], [0, 0, 1, 1], [], []>} : vector<32x32xf32>, vector<32x128xf32>, vector<32x128xf32> -> vector<32x128xf32>
    %10 = math.tanh %9 : vector<32x128xf32>
    %c0_6 = arith.constant 0 : index
    %c0_7 = arith.constant 0 : index
    %11 = vector.load %arg4[%c0_6, %c0_7] : memref<3x32xf32, #tpu.memory_space<vmem>>, vector<3x32xf32>
    %cst_8 = arith.constant dense<0.000000e+00> : vector<3x128xf32>
    %12 = tpu.matmul %11, %10, %cst_8 {dimension_numbers = #tpu.dot_dimension_numbers<[1], [0], [0], [1], [0, 0, 1, 1], [], []>} : vector<3x32xf32>, vector<32x128xf32>, vector<3x128xf32> -> vector<3x128xf32>
    %c0_9 = arith.constant 0 : index
    %c0_10 = arith.constant 0 : index
    %13 = vector.load %arg5[%c0_9, %c0_10] : memref<3x32xf32, #tpu.memory_space<vmem>>, vector<3x32xf32>
    %cst_11 = arith.constant dense<0.000000e+00> : vector<3x128xf32>
    %14 = tpu.matmul %13, %6, %cst_11 {dimension_numbers = #tpu.dot_dimension_numbers<[1], [0], [0], [1], [0, 0, 1, 1], [], []>} : vector<3x32xf32>, vector<32x128xf32>, vector<3x128xf32> -> vector<3x128xf32>
    %15 = arith.addf %12, %14 : vector<3x128xf32>
    %16 = arith.addf %15, %7 : vector<3x128xf32>
    %c0_12 = arith.constant 0 : index
    %c0_13 = arith.constant 0 : index
    %17 = vector.load %arg6[%c0_12, %c0_13] : memref<3x128xf32, #tpu.memory_space<vmem>>, vector<3x128xf32>
    tpu.vector_store %arg6[%c0_12, %c0_13], %16 {strides = array<i32>} : memref<3x128xf32, #tpu.memory_space<vmem>>, vector<3x128xf32>,
    return
  }
  func.func @transform_0(%arg0: i32) -> (i32, i32) {
    %c0_i32 = arith.constant 0 : i32
    %c0_i32_0 = arith.constant 0 : i32
    return %c0_i32, %arg0 : i32, i32
  }
  func.func @transform_1(%arg0: i32) -> (i32, i32) {
    %c0_i32 = arith.constant 0 : i32
    %c0_i32_0 = arith.constant 0 : i32
    %c0_i32_1 = arith.constant 0 : i32
    return %c0_i32, %c0_i32_0 : i32, i32
  }
  func.func @transform_2(%arg0: i32) -> (i32, i32) {
    %c0_i32 = arith.constant 0 : i32
    %c0_i32_0 = arith.constant 0 : i32
    %c0_i32_1 = arith.constant 0 : i32
    return %c0_i32, %c0_i32_0 : i32, i32
  }
  func.func @transform_3(%arg0: i32) -> (i32, i32) {
    %c0_i32 = arith.constant 0 : i32
    %c0_i32_0 = arith.constant 0 : i32
    %c0_i32_1 = arith.constant 0 : i32
    return %c0_i32, %c0_i32_0 : i32, i32
  }
  func.func @transform_4(%arg0: i32) -> (i32, i32) {
    %c0_i32 = arith.constant 0 : i32
    %c0_i32_0 = arith.constant 0 : i32
    %c0_i32_1 = arith.constant 0 : i32
    return %c0_i32, %c0_i32_0 : i32, i32
  }
  func.func @transform_5(%arg0: i32) -> (i32, i32) {
    %c0_i32 = arith.constant 0 : i32
    %c0_i32_0 = arith.constant 0 : i32
    return %c0_i32, %arg0 : i32, i32
  }
}

</mosaic_0001>

<bundles_post_ra>
// kernel: forward.1
= control target key start
LH: loop header
LB: loop body
LE: loop exit
PB: predicated region body
PF: predicated region fallthrough
CT: control target
= control target key end

     0   :  { %10 = vsyncpa [#allocation3], 0  ;;  %s795_s0 = inlined_call_operand.vmem [shape: f32[3,128], index: 0, kind: input, shape index: {}]   ;;  %s796_s1 = inlined_call_operand.hbm [shape: f32[67,3], index: 1, kind: input, shape index: {}]   ;;  %s797_s2 = inlined_call_operand.hbm [shape: f32[32,32], index: 2, kind: input, shape index: {}]   ;;  %s798_s3 = inlined_call_operand.vmem [shape: f32[3,32], index: 3, kind: input, shape index: {}]   ;;  %s799_s4 = inlined_call_operand.vmem [shape: f32[3,32], index: 4, kind: input, shape index: {}]   ;;  %s800_s5 = inlined_call_operand.vmem [shape: f32[3,128], index: 5, kind: output, shape index: {}]  }
   0x1   :  { %11 = vsyncpa [#allocation5], 0  ;;  %s683_s18 = smov [#allocation2]   ;;  %s635_s22 = scalar_lea.hbm %s796_s1, 1152 }
   0x2   :  { %s19_s19 = sshll.u32 %s683_s18, 4  ;;  %p636_p0 = scmp.ne.s32.totalorder %s796_s1, %s635_s22  ;;  %s20_s19 = int_to_ptr.vmem [resolvable:$true] %s19_s19 }
   0x3   :  { %p639_p1 = scmp.lt.u32.totalorder %s635_s22, %s796_s1 }
   0x5   :  { %p641_p2 = pnand %p639_p1, %p636_p0 }
   0x7   :  { %644 = shalt.err (!%p641_p2)
}
   0x8   :  { %s645_s27 = scalar_lea.vmem %s20_s19, 1152  ;;  %p650_p4 = scmp.lt.s32.totalorder %s20_s19, %s20_s19 }
   0x9   :  { %p646_p3 = scmp.ne.s32.totalorder %s20_s19, %s645_s27  ;;  %p651_p5 = scmp.lt.s32.totalorder %s645_s27, %s645_s27 }
   0xb   :  { %p652_p6 = por %p651_p5, %p650_p4 }
   0xd   :  { %p653_p7 = pnand %p652_p6, %p646_p3 }
   0xf   :  { %656 = shalt.err (!%p653_p7)
}
  0x10   :  { %s684_s28 = smov 128   ;;  %s685_s29 = smov 8  }
  0x11   :  { %25 = dma.hbm_to_vmem [thread:$0]  %s796_s1, 1152, %s20_s19, [#allocation3], %s684_s28, %s684_s28, %s685_s29  }
  0x12   :  { %s686_s7 = smov [#allocation4]   ;;  %s657_s11 = scalar_lea.hbm %s797_s2, 512 }
  0x13   :  { %s31_s8 = sshll.u32 %s686_s7, 4  ;;  %p658_p8 = scmp.ne.s32.totalorder %s797_s2, %s657_s11  ;;  %s32_s8 = int_to_ptr.vmem [resolvable:$true] %s31_s8 }
  0x14   :  { %p661_p9 = scmp.lt.u32.totalorder %s657_s11, %s797_s2 }
  0x16   :  { %p663_p10 = pnand %p661_p9, %p658_p8 }
  0x18   :  { %666 = shalt.err (!%p663_p10)
}
  0x19   :  { %s667_s16 = scalar_lea.vmem %s32_s8, 512  ;;  %p672_p12 = scmp.lt.s32.totalorder %s32_s8, %s32_s8 }
  0x1a   :  { %p668_p11 = scmp.ne.s32.totalorder %s32_s8, %s667_s16  ;;  %p673_p13 = scmp.lt.s32.totalorder %s667_s16, %s667_s16 }
  0x1c   :  { %p674_p0 = por %p673_p13, %p672_p12 }
  0x1e   :  { %p675_p1 = pnand %p674_p0, %p668_p11 }
  0x20   :  { %678 = shalt.err (!%p675_p1)
}
  0x21   :  { %37 = dma.hbm_to_vmem [thread:$0]  %s797_s2, 512, %s32_s8, [#allocation5], %s684_s28, %s684_s28, %s685_s29  }
  0x22   :  { %679 = dma.done.wait [#allocation3], 1152  }
  0x23   :  { %680 = vsyncadd [#allocation3], 4294966144 }
  0x24   :  { %681 = dma.done.wait [#allocation5], 512  }
  0x25   :  { %682 = vsyncadd [#allocation5], 4294966784  ;;  %v687_v0 = vmov 0.0   ;;  %vm688_vm0 = vmmov 0   ;;  %vm86_vm1 = vcmask 1042432   ;;  %vm58_vm2 = vcmask 23552  }
  0x26   :  { %514 = vmatprep.subr.mxu0 %v687_v0  ;;  %516 = vmatprep.mubr.msk.f32.mxu0 %vm688_vm0, %v687_v0  ;;  %v48_v1 = vld [vmem:[%s795_s0] sm:$0x7]  ;;  %v50_v3 = vld [vmem:[#allocation2 + $0x8] sm:$0xff]  ;;  %v51_v4 = vld [vmem:[#allocation2 + $0x10] sm:$0xff]  ;;  %vm212_vm3 = vcmask 261120   ;;  %v689_v42 = vmov 0.0|0.0  }
  0x27   :  { %599 = vmatprep.subr.mxu1 %v687_v0  ;;  %528 = vmatprep.mubr.msk.f32.mxu1 %vm688_vm0, %v687_v0  ;;  %v49_v2 = vld [vmem:[#allocation2] sm:$0xff]  ;;  %v52_v5 = vld [vmem:[#allocation2 + $0x18] sm:$0xff]  ;;  %v54_v7 = vld [vmem:[#allocation2 + $0x28] sm:$0xff] }
  0x28   :  { %515 = vmatpush3.msk.msra.mxu0 %vm86_vm1, %v48_v1  ;;  %600 = vmatpush3.msk.msra.mxu1 %vm86_vm1, %v48_v1  ;;  %v53_v6 = vld [vmem:[#allocation2 + $0x20] sm:$0xff]  ;;  %v55_v8 = vld [vmem:[#allocation2 + $0x30] sm:$0xff]  ;;  %v56_v9 = vld [vmem:[#allocation2 + $0x38] sm:$0xff] }
  0x29   :  { %517 = vmatmul.mubr.msk.f32.vlgmr.msra.gmra.mrb[0].mxu0 %vm58_vm2, %v49_v2  ;;  %529 = vmatmul.mubr.msk.f32.vlgmr.msra.gmra.mrb[0].mxu1 %vm58_vm2, %v53_v6  ;;  %v57_v10 = vld [vmem:[#allocation2 + $0x40] sm:$0x7]  ;;  %v208_v11 = vld [vmem:[#allocation4] sm:$0xff]  ;;  %v209_v26 = vld [vmem:[#allocation4 + $0x8] sm:$0xff] }
  0x2a   :  { %519 = vmatprep.mubr.msk.f32.mxu0 %vm688_vm0, %v687_v0  ;;  %531 = vmatprep.mubr.msk.f32.mxu1 %vm688_vm0, %v687_v0  ;;  %v210_v27 = vld [vmem:[#allocation4 + $0x10] sm:$0xff]  ;;  %v211_v28 = vld [vmem:[#allocation4 + $0x18] sm:$0xff] }
  0x2b   :  { %587 = vmatprep.subr.bf16.mxu0 %v689_v42  ;;  %v315_v46 = vld [vmem:[%s799_s4] sm:$0x7] }
  0x2c   :  { %v314_v57 = vld [vmem:[%s798_s3] sm:$0x7] }
  0x2d   :  { %520 = vmatmul.mubr.msk.f32.gmra.mrb[2].mxu0 %vm58_vm2, %v50_v3  ;;  %532 = vmatmul.mubr.msk.f32.gmra.mrb[2].mxu1 %vm58_vm2, %v54_v7 }
  0x2e   :  { %522 = vmatprep.mubr.msk.f32.mxu0 %vm688_vm0, %v687_v0  ;;  %534 = vmatprep.mubr.msk.f32.mxu1 %vm688_vm0, %v687_v0 }
  0x31   :  { %523 = vmatmul.mubr.msk.f32.gmra.mrb[4].mxu0 %vm58_vm2, %v51_v4  ;;  %535 = vmatmul.mubr.msk.f32.gmra.mrb[4].mxu1 %vm58_vm2, %v55_v8 }
  0x32   :  { %525 = vmatprep.mubr.msk.f32.mxu0 %vm688_vm0, %v687_v0  ;;  %537 = vmatprep.mubr.msk.f32.mxu1 %vm688_vm0, %v687_v0 }
  0x35   :  { %526 = vmatmul.mubr.msk.f32.gmra.mrb[6].mxu0 %vm58_vm2, %v52_v5  ;;  %538 = vmatmul.mubr.msk.f32.gmra.mrb[6].mxu1 %vm58_vm2, %v56_v9 }
  0x36   :  { %565 = vmatprep.mubr.msk.f32.mxu0 %vm688_vm0, %v687_v0  ;;  %540 = vmatprep.mubr.msk.f32.mxu1 %vm688_vm0, %v687_v0 }
  0x39   :  { %541 = vmatmul.mubr.msk.f32.gmra.mrb[8].mxu1 %vm58_vm2, %v57_v10 }
  0x3a   :  { %551 = vmatprep.mubr.msk.f32.mxu1 %vm212_vm3, %v208_v11 }
  0xfc   :  { %v156_v12 = vpop.f32.mrb[0].mxu0  ;;  %v176_v29 = vpop.f32.mrb[0].mxu1 }
  0xfd   :  { %v518_v13 = vpop.f32.mrb[1].mxu0  ;;  %611 = vtanh.f32 %v156_v12  ;;  %v530_v30 = vpop.f32.mrb[1].mxu1 }
 0x100   :  { %v161_v14 = vpop.f32.mrb[2].mxu0  ;;  %v181_v31 = vpop.f32.mrb[2].mxu1 }
 0x101   :  { %613 = vtanh.f32 %v161_v14  ;;  %v521_v15 = vpop.f32.mrb[3].mxu0  ;;  %v533_v32 = vpop.f32.mrb[3].mxu1 }
 0x104   :  { %v166_v16 = vpop.f32.mrb[4].mxu0  ;;  %v186_v33 = vpop.f32.mrb[4].mxu1 }
 0x105   :  { %v524_v17 = vpop.f32.mrb[5].mxu0  ;;  %615 = vtanh.f32 %v166_v16  ;;  %v536_v34 = vpop.f32.mrb[5].mxu1 }
 0x107   :  { %v612_v20 = vpop.eup %611 }
 0x108   :  { %v171_v18 = vpop.f32.mrb[6].mxu0  ;;  %v191_v35 = vpop.f32.mrb[6].mxu1 }
 0x109   :  { %617 = vtanh.f32 %v171_v18  ;;  %v527_v19 = vpop.f32.mrb[7].mxu0  ;;  %v539_v37 = vpop.f32.mrb[7].mxu1 }
 0x10a   :  { %619 = vtanh.f32 %v176_v29 }
 0x10b   :  { %v614_v21 = vpop.eup %613  ;;  %621 = vtanh.f32 %v181_v31 }
 0x10c   :  { %v579_v22 = vpack.c.bf16 %v614_v21, %v612_v20  ;;  %623 = vtanh.f32 %v186_v33  ;;  %v196_v39 = vpop.f32.mrb[8].mxu1 }
 0x10d   :  { %625 = vtanh.f32 %v191_v35  ;;  %v542_v41 = vpop.f32.mrb[9].mxu1 }
 0x10e   :  { %580 = vmatprep.subr.bf16.mxu1 %v579_v22 }
 0x10f   :  { %582 = vmatpush3.bf16.msra.mxu1 %v579_v22  ;;  %v616_v23 = vpop.eup %615 }
 0x113   :  { %v618_v24 = vpop.eup %617 }
 0x114   :  { %v583_v25 = vpack.c.bf16 %v618_v24, %v616_v23  ;;  %v620_v36 = vpop.eup %619 }
 0x115   :  { %v622_v38 = vpop.eup %621 }
 0x116   :  { %584 = vmatprep.subr.bf16.mxu1 %v583_v25  ;;  %v588_v40 = vpack.c.bf16 %v622_v38, %v620_v36  ;;  %v624_v43 = vpop.eup %623 }
 0x117   :  { %586 = vmatpush3.bf16.msra.mxu1 %v583_v25  ;;  %v626_v44 = vpop.eup %625 }
 0x118   :  { %589 = vmatpush3.bf16.msra.mxu0 %v588_v40  ;;  %v591_v45 = vpack.c.bf16 %v626_v44, %v624_v43 }
 0x119   :  { %590 = vmatprep.subr.bf16.mxu0 %v689_v42 }
 0x11a   :  { %552 = vmatmul.mubr.msk.f32.vlgmr.msra.gmra.mrb[10].mxu1 %vm212_vm3, %v209_v26 }
 0x11b   :  { %554 = vmatprep.mubr.msk.f32.mxu1 %vm212_vm3, %v210_v27 }
 0x11c   :  { %592 = vmatpush3.bf16.msra.mxu0 %v591_v45 }
 0x11d   :  { %593 = vmatprep.subr.bf16.mxu0 %v689_v42 }
 0x11e   :  { %555 = vmatmul.mubr.msk.f32.gmra.mrb[12].mxu1 %vm212_vm3, %v211_v28 }
 0x11f   :  { %566 = vmatmul.mubr.msk.f32.vlgmr.msra.gmra.mrb[8].mxu0 %vm212_vm3, %v315_v46 }
 0x120   :  { %576 = vmatprep.mubr.msk.f32.mxu0 %vm688_vm0, %v687_v0 }
 0x1ed   :  { %v553_v47 = vpop.f32.mrb[10].mxu1 }
 0x1ee   :  { %627 = vtanh.f32 %v553_v47  ;;  %v291_v48 = vpop.f32.mrb[11].mxu1 }
 0x1ef   :  { %629 = vtanh.f32 %v291_v48 }
 0x1f1   :  { %v556_v49 = vpop.f32.mrb[12].mxu1 }
 0x1f2   :  { %631 = vtanh.f32 %v556_v49  ;;  %v301_v50 = vpop.f32.mrb[13].mxu1 }
 0x1f3   :  { %633 = vtanh.f32 %v301_v50 }
 0x1f8   :  { %v628_v51 = vpop.eup %627 }
 0x1f9   :  { %v630_v52 = vpop.eup %629 }
 0x1fa   :  { %v594_v53 = vpack.c.bf16 %v628_v51, %v630_v52 }
 0x1fc   :  { %v632_v54 = vpop.eup %631  ;;  %595 = vmatpush3.bf16.msra.mxu0 %v594_v53 }
 0x1fd   :  { %v634_v55 = vpop.eup %633  ;;  %596 = vmatprep.subr.bf16.mxu0 %v689_v42 }
 0x1fe   :  { %v597_v56 = vpack.c.bf16 %v632_v54, %v634_v55 }
 0x200   :  { %598 = vmatpush3.bf16.msra.mxu0 %v597_v56 }
 0x203   :  { %577 = vmatmul.mubr.msk.f32.vlgmr.msra.gmra.mrb[8].mxu0 %vm212_vm3, %v314_v57 }
 0x2d6   :  { %v458_v58 = vpop.f32.mrb[8].mxu0 }
 0x2d7   :  { %v601_v59 = vadd.f32 %v458_v58, %v196_v39  ;;  %v578_v60 = vpop.f32.mrb[9].mxu0 }
 0x2d9   :  { %463 = vst [vmem:[%s800_s5] sm:$0x7] %v601_v59 }
 0x2da   :  { %468 = vsyncpa [#allocation3], 1 }
 0x2db   :  { %469 = vsyncpa [#allocation5], 1 }

</bundles_post_ra>
